<compile_context>
chip_gen: v7x
topology: tpu7x:2x2x1
jax: 0.10.0
libtpu: 0.0.40
codegen_flags: <defaults>
</compile_context>

<pallas_src>
import jax
import jax.numpy as jnp
from jax.experimental import pallas as pl
from jax.experimental.pallas import tpu as pltpu

LANE = 128


def _swish_kernel(x_ref, o_ref):
    x = x_ref[...]
    # Elementwise: VPU (mul/add) + EUP (exp inside sigmoid). Compute in f32
    # (no-op for f32 inputs) for parity with the PyTorch f32 reference.
    cdt = jnp.promote_types(x.dtype, jnp.float32)
    xf = x.astype(cdt)
    o_ref[...] = (xf * jax.nn.sigmoid(xf)).astype(o_ref.dtype)


def _round_up(a, b):
    return ((a + b - 1) // b) * b


def _swish_2d(x2d, block_rows):
    rows, _ = x2d.shape
    itemsize = jnp.dtype(x2d.dtype).itemsize
    n = rows * LANE
    grid = (pl.cdiv(rows, block_rows),)
    return pl.pallas_call(
        _swish_kernel,
        out_shape=jax.ShapeDtypeStruct((rows, LANE), x2d.dtype),
        grid_spec=pltpu.PrefetchScalarGridSpec(
            num_scalar_prefetch=0,
            grid=grid,
            in_specs=[pl.BlockSpec((block_rows, LANE), lambda i: (i, 0))],
            out_specs=pl.BlockSpec((block_rows, LANE), lambda i: (i, 0)),
        ),
        compiler_params=pltpu.CompilerParams(
            dimension_semantics=("parallel",),   # megacore sharding on v7x
            vmem_limit_bytes=40 << 20,           # room for 4 MiB double-buffered blocks
        ),
        cost_estimate=pl.CostEstimate(
            flops=4 * n,                 # negate/add/recip/mul around the exp
            transcendentals=n,           # one exp per element
            bytes_accessed=2 * n * itemsize,   # read x + write y: mem-bound
        ),
    )(x2d)


def swish(x):
    """Elementwise x * sigmoid(x) via a Pallas TPU kernel.

    Accepts any shape / floating dtype. The bulk of the tensor is processed as
    a lane-dense (rows, 128) slab with large, balanced blocks; only a sub-128
    element tail (if any) falls back to plain jnp.
    """
    orig_shape = x.shape
    dtype = x.dtype
    n = x.size

    if n == 0:
        return x

    itemsize = jnp.dtype(dtype).itemsize
    sublane = max(8, 32 // itemsize)          # 8 (f32), 16 (bf16), 32 (8-bit)
    # ~4 MiB block regardless of dtype; multiple of `sublane` by construction.
    max_block_rows = max(sublane, (4 << 20) // (LANE * itemsize))

    x_flat = x.reshape(-1)
    n_main = (n // LANE) * LANE               # largest lane-aligned prefix
    n_tail = n - n_main

    pieces = []
    if n_main > 0:
        x_main = x_flat if n_tail == 0 else x_flat[:n_main]
        rows = n_main // LANE

        # Number of grid steps: at least 2 when there is enough work so v7x's
        # two TensorCores both stream; otherwise a single full-array block.
        num_blocks = pl.cdiv(rows, max_block_rows)
        if rows >= 2 * sublane:
            num_blocks = max(2, num_blocks)

        if num_blocks == 1:
            block_rows = rows                 # full-array block: always legal
        else:
            # Balanced blocks, rounded up to the dtype sublane so the
            # BlockSpec satisfies the (8, 128) divisibility rule; the (rare)
            # partial last block is masked by Pallas.
            block_rows = _round_up(pl.cdiv(rows, num_blocks), sublane)

        out2d = _swish_2d(x_main.reshape(rows, LANE), block_rows)
        pieces.append(out2d.reshape(-1))

    if n_tail > 0:
        # Tail is < 128 elements -> plain jnp, negligible.
        cdt = jnp.promote_types(dtype, jnp.float32)
        tail = x_flat[n_main:].astype(cdt)
        pieces.append((tail * jax.nn.sigmoid(tail)).astype(dtype))

    out_flat = pieces[0] if len(pieces) == 1 else jnp.concatenate(pieces)
    return out_flat.reshape(orig_shape)


if __name__ == "__main__":
    key = jax.random.PRNGKey(0)

    def _ref(v):
        return v * jax.nn.sigmoid(v)

    # NCHW input, matching the PyTorch module's typical usage.
    # 2048 elems -> 16 rows -> 2 balanced blocks (exercises the grid>=2 path).
    x = jax.random.normal(key, (2, 4, 16, 16), dtype=jnp.float32)
    y = jax.block_until_ready(swish(x))
    assert y.shape == x.shape and y.dtype == x.dtype
    assert jnp.allclose(y, _ref(x), atol=1e-6, rtol=1e-6)

    # Lane-aligned but not sublane-aligned (10 rows): single full-array block.
    x1 = jax.random.normal(jax.random.PRNGKey(2), (10, 128), dtype=jnp.float32)
    y1 = jax.block_until_ready(swish(x1))
    assert jnp.allclose(y1, _ref(x1), atol=1e-6, rtol=1e-6)

    # Not even lane-aligned: kernel prefix + tiny jnp tail path.
    x2 = jax.random.normal(jax.random.PRNGKey(1), (2, 3, 17, 13), dtype=jnp.float32)
    y2 = jax.block_until_ready(swish(x2))
    assert y2.shape == x2.shape
    assert jnp.allclose(y2, _ref(x2), atol=1e-6, rtol=1e-6)

    # Empty input no longer crashes.
    x3 = jnp.zeros((0, 4), dtype=jnp.float32)
    y3 = jax.block_until_ready(swish(x3))
    assert y3.shape == x3.shape

    print("KERNEL_OK")
</pallas_src>

<mosaic_0001>
module attributes {stable_mosaic.version = 11 : i64} {
  func.func @_swish_kernel(%arg0: i32, %arg1: memref<8x128xf32, #tpu.memory_space<vmem>>, %arg2: memref<8x128xf32, #tpu.memory_space<vmem>>) attributes {dimension_semantics = [#tpu.dimension_semantics<parallel>], iteration_bounds = array<i64: 2>, scalar_prefetch = 0 : i64, scratch_operands = 0 : i64, tpu.core_type = #tpu.core_type<tc>, window_params = [{transform_indices = @transform_0, window_bounds = array<i64: 8, 128>}, {transform_indices = @transform_1, window_bounds = array<i64: 8, 128>}]} {
    %c0 = arith.constant 0 : index
    %c0_0 = arith.constant 0 : index
    %0 = vector.load %arg1[%c0, %c0_0] : memref<8x128xf32, #tpu.memory_space<vmem>>, vector<8x128xf32>
    %1 = arith.negf %0 : vector<8x128xf32>
    %2 = math.exp %1 : vector<8x128xf32>
    %cst = arith.constant 1.000000e+00 : f32
    %3 = vector.broadcast %cst : f32 to vector<8x128xf32>
    %4 = arith.addf %3, %2 : vector<8x128xf32>
    %5 = arith.divf %3, %4 : vector<8x128xf32>
    %6 = arith.mulf %0, %5 : vector<8x128xf32>
    %c0_1 = arith.constant 0 : index
    %c0_2 = arith.constant 0 : index
    %7 = vector.load %arg2[%c0_1, %c0_2] : memref<8x128xf32, #tpu.memory_space<vmem>>, vector<8x128xf32>
    tpu.vector_store %arg2[%c0_1, %c0_2], %6 {strides = array<i32>} : memref<8x128xf32, #tpu.memory_space<vmem>>, vector<8x128xf32>,
    return
  }
  func.func @transform_0(%arg0: i32) -> (i32, i32) {
    %c0_i32 = arith.constant 0 : i32
    %c0_i32_0 = arith.constant 0 : i32
    return %arg0, %c0_i32 : i32, i32
  }
  func.func @transform_1(%arg0: i32) -> (i32, i32) {
    %c0_i32 = arith.constant 0 : i32
    %c0_i32_0 = arith.constant 0 : i32
    return %arg0, %c0_i32 : i32, i32
  }
}

</mosaic_0001>

<bundles_post_ra>
// kernel: tpu_custom_call.1
= control target key start
LH: loop header
LB: loop body
LE: loop exit
PB: predicated region body
PF: predicated region fallthrough
CT: control target
= control target key end

     0   :  { %6 = vsyncpa [#allocation3], 0  ;;  %s559_s0 = inlined_call_operand.hbm [shape: f32[16,128], index: 0, kind: input, shape index: {}]   ;;  %s560_s1 = inlined_call_operand.hbm [shape: f32[16,128], index: 1, kind: output, shape index: {}]  }
   0x1   :  { %8 = vsyncpa [#allocation3 + $0x1], 0 }
   0x2   :  { %9 = vsyncpa [#allocation4], 0 }
   0x3   :  { %11 = vsyncpa [#allocation4 + $0x1], 0  ;;  %s398_s6 = smov 0   ;;  %s400_s7 = smov 0  }
   0x4   :  { %s402_s8 = smov 0   ;;  %s404_s9 = smov 0  }
   0x5 LB: > { %s419_s10 = sadd.s32 4294967295, %s384_s9   ;;  %s225_s11 = sadd.s32 4294967294, %s384_s9   ;;  %s384_s9 = sphi %s404_s9, %s575_s9   ;;  %s380_s8 = sphi %s402_s8, %s574_s8   ;;  %s376_s7 = sphi %s400_s7, %s573_s7   ;;  %s372_s6 = sphi %s398_s6, %s572_s6  }
   0x6   : > { %s423_s12 = sadd.s32 1, %s384_s9   ;;  %s24_s13 = sadd.s32 1, %s380_s8 }
   0x7   : > { %s21_s14 = ssub.s32 %s384_s9, %s423_s12  ;;  %p31_p0 = scmp.ne.s32.totalorder %s380_s8, %s376_s7 }
   0x8   : > { %p22_p1 = scmp.eq.s32.totalorder %s21_s14, 0  ;;  %p32_p2 = scmp.eq.s32.totalorder %s384_s9, 0 }
   0x9   : > { %p37_p3 = scmp.ne.s32.totalorder %s376_s7, %s372_s6  ;;  %p38_p4 = scmp.eq.s32.totalorder %s419_s10, 0 }
   0xa   : > { %s435_s15 = scalar_select %p22_p1, %s380_s8, %s24_s13  }
   0xb   : > { %p437_p5 = por %p32_p2, %p31_p0  ;;  %p441_p6 = por %p38_p4, %p37_p3 }
   0xc   : > { %p61_p7 = scmp.eq.s32.totalorder %s419_s10, 1  ;;  %p67_p8 = scmp.eq.s32.totalorder %s225_s11, 1 }
   0xd   : > { %p250_p10 = scmp.lt.s32.totalorder %s384_s9, 2  ;;  %s87_s20 = sand.u32 1, %s380_s8  }
   0xe   : > { %p448_p11 = por %p61_p7, %p31_p0  ;;  %p452_p12 = por %p67_p8, %p37_p3 }
   0xf   : > { %s229_s21 = sshll.u32 %s384_s9, 7  ;;  %s228_s22 = sshll.u32 %s87_s20, 3 }
  0x10   : > { %s564_s18 = scalar_select %p448_p11, 1, 0 }
  0x11   : > { %s565_s19 = scalar_select %p452_p12, 1, 0 }
  0x12   : > { %s461_s25 = scalar_lea.hbm %s559_s0, %s229_s21  ;;  %s91_s26 = scalar_lea.vmem [#allocation2], %s228_s22 }
  0x13   : > { %s98_s27 = sshll.u32 %s91_s26, 4  ;;  %p465_p13 = pnand %p250_p10, %p437_p5  ;;  %s469_s27 = int_to_ptr.vmem [resolvable:$true] %s98_s27 }
  0x14   : > { %s88_s29 = scalar_lea.sflag [#allocation3], %s87_s20  ;;  %s288_s30 = scalar_lea.hbm %s461_s25, 128 }
  0x15   : > { %p289_p2 = scmp.ne.s32.totalorder %s461_s25, %s288_s30  ;;  %p290_p3 = pneg %p465_p13 }
  0x16   : > { %s293_s4 = scalar_lea.hbm %s559_s0, 256  ;;  %p294_p5 = scmp.lt.u32.totalorder %s461_s25, %s559_s0 }
  0x17   : > { %p291_p4 = pnand %p290_p3, %p289_p2  ;;  %p295_p8 = scmp.lt.u32.totalorder %s293_s4, %s288_s30 }
  0x18   : > { %p297_p9 = scmp.lt.u32.totalorder %s288_s30, %s461_s25 }
  0x19   : > { %p292_p7 = pneg %p291_p4  ;;  %p296_p10 = por %p295_p8, %p294_p5 }
  0x1b   : > { %p298_p0 = por %p297_p9, %p296_p10 }
  0x1d   : > { %p299_p1 = pnand %p298_p0, %p292_p7 }
  0x1f   : > { %302 = shalt.err (!%p299_p1)
}
  0x20   : > { %s303_s13 = scalar_lea.vmem %s469_s27, 128  ;;  %s386_s14 = smov [#allocation2]  }
  0x21   : > { %p304_p2 = scmp.ne.s32.totalorder %s469_s27, %s303_s13  ;;  %s308_s16 = sshll.u32 %s386_s14, 4  ;;  %s309_s16 = int_to_ptr.vmem [resolvable:$false] %s308_s16 }
  0x22   : > { %s310_s20 = scalar_lea.vmem %s309_s16, 256  ;;  %p311_p11 = scmp.lt.s32.totalorder %s469_s27, %s309_s16 }
  0x23   : > { %p306_p4 = pnand %p304_p2, %p290_p3  ;;  %p312_p5 = scmp.lt.s32.totalorder %s310_s20, %s303_s13 }
  0x25   : > { %p307_p12 = pneg %p306_p4  ;;  %p313_p8 = por %p312_p5, %p311_p11 }
  0x27   : > { %p314_p9 = pnand %p313_p8, %p307_p12 }
  0x29   : > { %317 = shalt.err (!%p314_p9)
}
  0x2a   : > { %245 = dma.hbm_to_vmem [thread:$0]  (!%p465_p13), %s461_s25, 128, %s469_s27, %s88_s29  }
  0x2b   : > { %p567_p0 = scmp.lt.s32.totalorder %s384_s9, 3  ;;  %p568_p1 = scmp.ge.s32.totalorder %s384_s9, 1 }
  0x2d   : > { %p104_p3 = pnand %p568_p1, %p567_p0 }
  0x2e   : > { %s503_s21 = sand.u32 (!%p104_p3), 1, %s376_s7  }
  0x2f   : > { %107 = sbr.rel (%p104_p3) target bundleno = 98 (0x62), region = 24  ;;  %s231_s22 = sshll.u32 (!%p104_p3), %s503_s21, 3 }
  0x30   : > { %s110_s23 = scalar_lea.sflag (!%p104_p3), [#allocation3], %s503_s21  ;;  %s113_s24 = scalar_lea.vmem (!%p104_p3), [#allocation2], %s231_s22 }
  0x36   : > { %363 = dma.done.wait (%p441_p6), %s110_s23, 128  }
  0x37   : > { %365 = vsyncadd (%p441_p6), %s110_s23, 4294967168  ;;  %v132_v0 = vld [vmem:[%s113_s24] sm:$0xff]  ;;  %s131_s25 = scalar_lea.vmem [#allocation5], %s231_s22  ;;  %s235_s27 = sshll.u32 %s419_s10, 7 }
  0x38   : > { %v233_v1 = vmul.f32 -1.442695, %v132_v0  ;;  %s155_s26 = sshll.u32 %s131_s25, 4  ;;  %s517_s17 = scalar_lea.hbm %s560_s1, %s235_s27  ;;  %s512_s26 = int_to_ptr.vmem [resolvable:$true] %s155_s26 }
  0x39   : > { %s142_s30 = scalar_lea.sflag [#allocation4], %s503_s21  ;;  %s318_s2 = scalar_lea.vmem %s512_s26, 128 }
  0x3a   : > { %284 = vpow2.f32 %v233_v1  ;;  %p319_p6 = scmp.ne.s32.totalorder %s512_s26, %s318_s2  ;;  %p569_p11 = scmp.ne.s32.totalorder %s564_s18, 0 }
  0x3b   : > { %s387_s10 = smov [#allocation5]  }
  0x3c   : > { %p320_p12 = pnand %p319_p6, %p569_p11  ;;  %s322_s3 = sshll.u32 %s387_s10, 4  ;;  %s323_s3 = int_to_ptr.vmem [resolvable:$false] %s322_s3 }
  0x3d   : > { %s324_s4 = scalar_lea.vmem %s323_s3, 256  ;;  %p325_p7 = scmp.lt.s32.totalorder %s512_s26, %s323_s3 }
  0x3e   : > { %p321_p13 = pneg %p320_p12  ;;  %p326_p10 = scmp.lt.s32.totalorder %s324_s4, %s318_s2 }
  0x40   : > { %p327_p2 = por %p326_p10, %p325_p7 }
  0x42   : > { %p328_p4 = pnand %p327_p2, %p321_p13 }
  0x44   : > { %v285_v2 = vpop.eup %284 }
  0x45   : > { %v136_v3 = vadd.f32 1.0, %v285_v2 }
  0x47   : > { %286 = vrcp.f32 %v136_v3 }
  0x51   : > { %v287_v4 = vpop.eup %286 }
  0x52   : > { %v139_v5 = vmul.f32 %v287_v4, %v132_v0 }
  0x54   : > { %140 = vst [vmem:[%s131_s25] sm:$0xff] %v139_v5 }
  0x55   : > { %331 = shalt.err (!%p328_p4)
}
  0x56   : > { %s332_s5 = scalar_lea.hbm %s517_s17, 128  ;;  %s336_s14 = scalar_lea.hbm %s560_s1, 256 }
  0x57   : > { %p333_p5 = scmp.ne.s32.totalorder %s517_s17, %s332_s5  ;;  %p337_p0 = scmp.lt.u32.totalorder %s517_s17, %s560_s1 }
  0x58   : > { %p338_p1 = scmp.lt.u32.totalorder %s336_s14, %s332_s5  ;;  %p340_p6 = scmp.lt.u32.totalorder %s332_s5, %s517_s17 }
  0x59   : > { %p334_p8 = pnand %p333_p5, %p569_p11 }
  0x5a   : > { %p339_p3 = por %p338_p1, %p337_p0 }
  0x5b   : > { %p335_p9 = pneg %p334_p8 }
  0x5c   : > { %p341_p12 = por %p340_p6, %p339_p3 }
  0x5e   : > { %p342_p13 = pnand %p341_p12, %p335_p9 }
  0x60   : > { %345 = shalt.err (!%p342_p13)
}
  0x61   : > { %240 = dma.vmem_to_hbm [thread:$0]  (%p569_p11), %s512_s26, 128, %s517_s17, %s142_s30  }
  0x62 PF: > { %s167_s21 = sand.u32 1, %s372_s6   ;;  %p570_p7 = scmp.ne.s32.totalorder %s565_s19, 0 }
  0x63   : > { %p571_p10 = scmp.ge.s32.totalorder %s384_s9, 2  ;;  %s168_s22 = scalar_lea.sflag [#allocation4], %s167_s21 }
  0x65   : > { %p247_p2 = pnand %p571_p10, %p570_p7 }
  0x67   : > { %367 = dma.done.wait (!%p247_p2), %s168_s22, 128  }
  0x68   : > { %369 = vsyncadd (!%p247_p2), %s168_s22, 4294967168  ;;  %p14_p4 = scmp.ge.s32.totalorder %s423_s12, 4   ;;  %s572_s6 = smov %s376_s7 }
  0x69   : > { %s573_s7 = smov %s380_s8  ;;  %s574_s8 = smov %s435_s15 }
  0x6a   : > { %s575_s9 = smov %s423_s12  ;;  %16 = sbr.rel (!%p14_p4) target bundleno = 5 (0x5), region = 69 }
  0x71   :  { %173 = vsyncpa [#allocation3], 1 }
  0x72   :  { %175 = vsyncpa [#allocation3 + $0x1], 1 }
  0x73   :  { %176 = vsyncpa [#allocation4], 1 }
  0x74   :  { %178 = vsyncpa [#allocation4 + $0x1], 1 }

</bundles_post_ra>
